<compile_context>
chip_gen: v7x
topology: tpu7x:2x2x1
jax: 0.10.0
libtpu: 0.0.40
codegen_flags: <defaults>
</compile_context>

<pallas_src>
import functools

import jax
import jax.numpy as jnp
from jax import lax
from jax.experimental import pallas as pl
from jax.experimental.pallas import tpu as pltpu

_NSEM = 32                       # DMA-semaphore ring depth (rows in flight per grid step)
_VMEM_BLOCK_BUDGET = 48 << 20    # max VMEM allowed for the block-streaming variant


def _gather_rows_kernel(src_idx_ref, x_ref, o_ref, copy_sem, *,
                        out_tokens, nsem, src_is_block):
    """Compact kept token rows for one batch element via a ring of row DMAs.

    src_idx_ref : SMEM (B*out_tokens,) int32 -- flat scalar-prefetched source
                  token ids (CLS row / +1 patch offset already folded in).
    x_ref       : src_is_block=True : VMEM (1, N, D) streamed input block
                  src_is_block=False: HBM  (B, N, D) raw ref (pl.ANY)
    o_ref       : VMEM (1, out_tokens, D)    -- auto-pipelined output block.
    copy_sem    : DMA semaphore ring (nsem,).
    """
    b = pl.program_id(0)
    base = b * out_tokens

    def src_at(src_tok):
        if src_is_block:
            return x_ref.at[0, pl.ds(src_tok, 1), :]
        return x_ref.at[b, pl.ds(src_tok, 1), :]

    def row_copy(src_tok, dst_tok, slot):
        return pltpu.make_async_copy(
            src_at(src_tok),
            o_ref.at[0, pl.ds(dst_tok, 1), :],
            copy_sem.at[slot],
        )

    n_pro = min(nsem, out_tokens)

    # Prologue: fill the ring, no waits (branch-free).
    def prologue(i, carry):
        row_copy(src_idx_ref[base + i], i, i).start()
        return carry

    lax.fori_loop(0, n_pro, prologue, 0, unroll=True)

    # Steady state: wait-then-start on the recycled slot.  The SMEM index read
    # is hoisted above the wait so the scalar load overlaps it (.wait() breaks
    # sst->sld forwarding otherwise).
    if n_pro < out_tokens:
        def steady(i, carry):
            src = src_idx_ref[base + i]
            slot = i % nsem
            row_copy(0, 0, slot).wait()     # dummy descriptor: identical (1, D) size
            row_copy(src, i, slot).start()
            return carry

        lax.fori_loop(n_pro, out_tokens, steady, 0, unroll=8)

    # Drain every copy still in flight so the output writeback sees final data.
    def drain(j, carry):
        row_copy(0, 0, j).wait()
        return carry

    lax.fori_loop(0, n_pro, drain, 0, unroll=True)


def patch_dropout(x, key, *, p=0.25, exclude_first_token=True, training=True):
    """JAX/Pallas equivalent of PatchDropout.forward."""
    assert 0.0 <= p < 1.0
    if (not training) or p == 0.0:
        return x

    B, N, D = x.shape
    num_tokens = N - 1 if exclude_first_token else N
    keep_prob = 1.0 - p
    num_keep = max(1, int(num_tokens * keep_prob))
    out_tokens = num_keep + (1 if exclude_first_token else 0)

    # --- glue: random keep indices (torch.randn(...).topk(...).indices) ---
    # TODO(synk): uses JAX's RNG stream, not torch.randn -- same random-subset
    # semantics, different concrete draws.
    rand = jax.random.normal(key, (B, num_tokens), dtype=jnp.float32)
    _, keep_idx = jax.lax.top_k(rand, num_keep)          # (B, num_keep)
    keep_idx = keep_idx.astype(jnp.int32)

    # Fold CLS passthrough (+1 patch offset) into one per-batch source index
    # table; flatten to 1-D so SMEM padding stays next_pow2(4*B*out_tokens) B.
    if exclude_first_token:
        src_idx = jnp.concatenate(
            [jnp.zeros((B, 1), jnp.int32), keep_idx + 1], axis=1)  # (B, 1+keep)
    else:
        src_idx = keep_idx                                         # (B, keep)
    src_idx = src_idx.reshape(B * out_tokens)

    itemsize = jnp.dtype(x.dtype).itemsize
    nsem = min(_NSEM, out_tokens)

    # Structure selection: at moderate drop rates a full sequential block read
    # at ~HBM roofline beats latency-bound scattered row reads, even though it
    # moves 1/(1-p)x more bytes; the row compaction then happens VMEM->VMEM.
    block_vmem = 2 * (N + out_tokens) * D * itemsize   # double-buffered in + out blocks
    use_block = (keep_prob >= 0.5) and (block_vmem <= _VMEM_BLOCK_BUDGET)

    if use_block:
        x_spec = pl.BlockSpec((1, N, D), lambda b, idx: (b, 0, 0))
        bytes_accessed = (B * N * D + B * out_tokens * D) * itemsize
        vmem_limit = min(max(block_vmem + (1 << 20), 32 << 20), 100 << 20)
    else:
        x_spec = pl.BlockSpec(memory_space=pl.ANY)     # rows DMA'd on demand from HBM
        bytes_accessed = 2 * B * out_tokens * D * itemsize
        vmem_limit = min(max(2 * out_tokens * D * itemsize + (1 << 20), 32 << 20),
                         100 << 20)

    kernel = functools.partial(
        _gather_rows_kernel, out_tokens=out_tokens, nsem=nsem,
        src_is_block=use_block)

    cost = pl.CostEstimate(flops=0, transcendentals=0,
                           bytes_accessed=bytes_accessed)

    out = pl.pallas_call(
        kernel,
        out_shape=jax.ShapeDtypeStruct((B, out_tokens, D), x.dtype),
        grid_spec=pltpu.PrefetchScalarGridSpec(
            num_scalar_prefetch=1,                   # src_idx -> SMEM
            grid=(B,),
            in_specs=[x_spec],
            out_specs=pl.BlockSpec((1, out_tokens, D), lambda b, idx: (b, 0, 0)),
            scratch_shapes=[pltpu.SemaphoreType.DMA((nsem,))],
        ),
        compiler_params=pltpu.CompilerParams(
            dimension_semantics=("parallel",),       # megacore-shard batch on v7x
            vmem_limit_bytes=vmem_limit,
        ),
        cost_estimate=cost,
    )(src_idx, x)
    return out


def _reference_patch_dropout(x, key, *, p, exclude_first_token=True):
    """Pure-JAX reference mirroring the PyTorch forward (same RNG as wrapper)."""
    B, N, D = x.shape
    num_tokens = N - 1 if exclude_first_token else N
    num_keep = max(1, int(num_tokens * (1.0 - p)))
    rand = jax.random.normal(key, (B, num_tokens), dtype=jnp.float32)
    _, keep_idx = jax.lax.top_k(rand, num_keep)
    if exclude_first_token:
        cls_tok, patches = x[:, :1], x[:, 1:]
        gathered = jnp.take_along_axis(patches, keep_idx[..., None], axis=1)
        return jnp.concatenate([cls_tok, gathered], axis=1)
    return jnp.take_along_axis(x, keep_idx[..., None], axis=1)


if __name__ == "__main__":
    # Small shapes: batch=2, tokens = 1 CLS + 8 patches = 9, dim = 128.
    B, N, D = 2, 9, 128
    p = 0.25  # keep = max(1, int(8 * 0.75)) = 6 patches -> output (2, 7, 128)

    root = jax.random.PRNGKey(0)
    kx, kdrop = jax.random.split(root)
    x = jax.random.normal(kx, (B, N, D), dtype=jnp.float32)

    # exclude_first_token=True, keep_prob=0.75 -> block-streaming variant.
    out = patch_dropout(x, kdrop, p=p, exclude_first_token=True, training=True)
    out = jax.block_until_ready(out)
    ref = _reference_patch_dropout(x, kdrop, p=p, exclude_first_token=True)
    assert out.shape == ref.shape, (out.shape, ref.shape)
    assert jnp.allclose(out, ref), "Pallas PatchDropout mismatch (exclude_first_token=True)"

    # exclude_first_token=False, keep_prob=0.75 -> block-streaming variant.
    out_nf = patch_dropout(x, kdrop, p=p, exclude_first_token=False, training=True)
    out_nf = jax.block_until_ready(out_nf)
    ref_nf = _reference_patch_dropout(x, kdrop, p=p, exclude_first_token=False)
    assert out_nf.shape == ref_nf.shape, (out_nf.shape, ref_nf.shape)
    assert jnp.allclose(out_nf, ref_nf), "Pallas PatchDropout mismatch (exclude_first_token=False)"

    # High drop rate (keep_prob=0.1 < 0.5) -> per-row HBM gather variant.
    out_hi = patch_dropout(x, kdrop, p=0.9, exclude_first_token=True, training=True)
    out_hi = jax.block_until_ready(out_hi)
    ref_hi = _reference_patch_dropout(x, kdrop, p=0.9, exclude_first_token=True)
    assert out_hi.shape == ref_hi.shape, (out_hi.shape, ref_hi.shape)
    assert jnp.allclose(out_hi, ref_hi), "Pallas PatchDropout mismatch (HBM gather path)"

    # Identity path (eval mode / p == 0) behaves like the PyTorch module.
    ident = patch_dropout(x, kdrop, p=p, training=False)
    assert jnp.array_equal(ident, x)

    print("KERNEL_OK")
</pallas_src>

<mosaic_0001>
module attributes {stable_mosaic.version = 11 : i64} {
  func.func @_gather_rows_kernel(%arg0: i32, %arg1: memref<14xi32, #tpu.memory_space<smem>>, %arg2: memref<1x9x128xf32, #tpu.memory_space<vmem>>, %arg3: memref<1x7x128xf32, #tpu.memory_space<vmem>>, %arg4: memref<7x!tpu.dma_semaphore, #tpu.memory_space<semaphore_mem>>) attributes {dimension_semantics = [#tpu.dimension_semantics<parallel>], iteration_bounds = array<i64: 2>, scalar_prefetch = 1 : i64, scratch_operands = 1 : i64, tpu.core_type = #tpu.core_type<tc>, window_params = [{transform_indices = @transform_0, window_bounds = array<i64: 1, 9, 128>}, {transform_indices = @transform_1, window_bounds = array<i64: 1, 7, 128>}]} {
    %c7_i32 = arith.constant 7 : i32
    %0 = arith.muli %arg0, %c7_i32 : i32
    %c0_i32 = arith.constant 0 : i32
    %1 = arith.addi %0, %c0_i32 : i32
    %2 = arith.index_cast %1 : i32 to index
    %3 = memref.load %arg1[%2] : memref<14xi32, #tpu.memory_space<smem>>
    %c0_i32_0 = arith.constant 0 : i32
    %c0_i32_1 = arith.constant 0 : i32
    %c0_i32_2 = arith.constant 0 : i32
    %4 = tpu.memref_slice %arg2[%c0_i32_0, %3, %c0_i32_2] : memref<1x9x128xf32, #tpu.memory_space<vmem>> -> memref<1x1x128xf32, #tpu.memory_space<vmem>>
    %5 = tpu.memref_squeeze %4 : memref<1x1x128xf32, #tpu.memory_space<vmem>> -> memref<1x128xf32, #tpu.memory_space<vmem>>
    %c0_i32_3 = arith.constant 0 : i32
    %6 = tpu.memref_slice %arg3[%c0_i32_1, %c0_i32, %c0_i32_3] : memref<1x7x128xf32, #tpu.memory_space<vmem>> -> memref<1x1x128xf32, #tpu.memory_space<vmem>>
    %7 = tpu.memref_squeeze %6 : memref<1x1x128xf32, #tpu.memory_space<vmem>> -> memref<1x128xf32, #tpu.memory_space<vmem>>
    %8 = tpu.memref_slice %arg4[%c0_i32] : memref<7x!tpu.dma_semaphore, #tpu.memory_space<semaphore_mem>> -> memref<1x!tpu.dma_semaphore, #tpu.memory_space<semaphore_mem>>
    %9 = tpu.memref_squeeze %8 : memref<1x!tpu.dma_semaphore, #tpu.memory_space<semaphore_mem>> -> memref<!tpu.dma_semaphore, #tpu.memory_space<semaphore_mem>>
    tpu.enqueue_dma source(%5 : memref<1x128xf32, #tpu.memory_space<vmem>>) target(%7 : memref<1x128xf32, #tpu.memory_space<vmem>>) target_semaphore(%9 : memref<!tpu.dma_semaphore, #tpu.memory_space<semaphore_mem>>)
    %c1_i32 = arith.constant 1 : i32
    %10 = arith.addi %0, %c1_i32 : i32
    %11 = arith.index_cast %10 : i32 to index
    %12 = memref.load %arg1[%11] : memref<14xi32, #tpu.memory_space<smem>>
    %c0_i32_4 = arith.constant 0 : i32
    %c0_i32_5 = arith.constant 0 : i32
    %c0_i32_6 = arith.constant 0 : i32
    %13 = tpu.memref_slice %arg2[%c0_i32_4, %12, %c0_i32_6] : memref<1x9x128xf32, #tpu.memory_space<vmem>> -> memref<1x1x128xf32, #tpu.memory_space<vmem>>
    %14 = tpu.memref_squeeze %13 : memref<1x1x128xf32, #tpu.memory_space<vmem>> -> memref<1x128xf32, #tpu.memory_space<vmem>>
    %c0_i32_7 = arith.constant 0 : i32
    %15 = tpu.memref_slice %arg3[%c0_i32_5, %c1_i32, %c0_i32_7] : memref<1x7x128xf32, #tpu.memory_space<vmem>> -> memref<1x1x128xf32, #tpu.memory_space<vmem>>
    %16 = tpu.memref_squeeze %15 : memref<1x1x128xf32, #tpu.memory_space<vmem>> -> memref<1x128xf32, #tpu.memory_space<vmem>>
    %17 = tpu.memref_slice %arg4[%c1_i32] : memref<7x!tpu.dma_semaphore, #tpu.memory_space<semaphore_mem>> -> memref<1x!tpu.dma_semaphore, #tpu.memory_space<semaphore_mem>>
    %18 = tpu.memref_squeeze %17 : memref<1x!tpu.dma_semaphore, #tpu.memory_space<semaphore_mem>> -> memref<!tpu.dma_semaphore, #tpu.memory_space<semaphore_mem>>
    tpu.enqueue_dma source(%14 : memref<1x128xf32, #tpu.memory_space<vmem>>) target(%16 : memref<1x128xf32, #tpu.memory_space<vmem>>) target_semaphore(%18 : memref<!tpu.dma_semaphore, #tpu.memory_space<semaphore_mem>>)
    %c2_i32 = arith.constant 2 : i32
    %19 = arith.addi %0, %c2_i32 : i32
    %20 = arith.index_cast %19 : i32 to index
    %21 = memref.load %arg1[%20] : memref<14xi32, #tpu.memory_space<smem>>
    %c0_i32_8 = arith.constant 0 : i32
    %c0_i32_9 = arith.constant 0 : i32
    %c0_i32_10 = arith.constant 0 : i32
    %22 = tpu.memref_slice %arg2[%c0_i32_8, %21, %c0_i32_10] : memref<1x9x128xf32, #tpu.memory_space<vmem>> -> memref<1x1x128xf32, #tpu.memory_space<vmem>>
    %23 = tpu.memref_squeeze %22 : memref<1x1x128xf32, #tpu.memory_space<vmem>> -> memref<1x128xf32, #tpu.memory_space<vmem>>
    %c0_i32_11 = arith.constant 0 : i32
    %24 = tpu.memref_slice %arg3[%c0_i32_9, %c2_i32, %c0_i32_11] : memref<1x7x128xf32, #tpu.memory_space<vmem>> -> memref<1x1x128xf32, #tpu.memory_space<vmem>>
    %25 = tpu.memref_squeeze %24 : memref<1x1x128xf32, #tpu.memory_space<vmem>> -> memref<1x128xf32, #tpu.memory_space<vmem>>
    %26 = tpu.memref_slice %arg4[%c2_i32] : memref<7x!tpu.dma_semaphore, #tpu.memory_space<semaphore_mem>> -> memref<1x!tpu.dma_semaphore, #tpu.memory_space<semaphore_mem>>
    %27 = tpu.memref_squeeze %26 : memref<1x!tpu.dma_semaphore, #tpu.memory_space<semaphore_mem>> -> memref<!tpu.dma_semaphore, #tpu.memory_space<semaphore_mem>>
    tpu.enqueue_dma source(%23 : memref<1x128xf32, #tpu.memory_space<vmem>>) target(%25 : memref<1x128xf32, #tpu.memory_space<vmem>>) target_semaphore(%27 : memref<!tpu.dma_semaphore, #tpu.memory_space<semaphore_mem>>)
    %c3_i32 = arith.constant 3 : i32
    %28 = arith.addi %0, %c3_i32 : i32
    %29 = arith.index_cast %28 : i32 to index
    %30 = memref.load %arg1[%29] : memref<14xi32, #tpu.memory_space<smem>>
    %c0_i32_12 = arith.constant 0 : i32
    %c0_i32_13 = arith.constant 0 : i32
    %c0_i32_14 = arith.constant 0 : i32
    %31 = tpu.memref_slice %arg2[%c0_i32_12, %30, %c0_i32_14] : memref<1x9x128xf32, #tpu.memory_space<vmem>> -> memref<1x1x128xf32, #tpu.memory_space<vmem>>
    %32 = tpu.memref_squeeze %31 : memref<1x1x128xf32, #tpu.memory_space<vmem>> -> memref<1x128xf32, #tpu.memory_space<vmem>>
    %c0_i32_15 = arith.constant 0 : i32
    %33 = tpu.memref_slice %arg3[%c0_i32_13, %c3_i32, %c0_i32_15] : memref<1x7x128xf32, #tpu.memory_space<vmem>> -> memref<1x1x128xf32, #tpu.memory_space<vmem>>
    %34 = tpu.memref_squeeze %33 : memref<1x1x128xf32, #tpu.memory_space<vmem>> -> memref<1x128xf32, #tpu.memory_space<vmem>>
    %35 = tpu.memref_slice %arg4[%c3_i32] : memref<7x!tpu.dma_semaphore, #tpu.memory_space<semaphore_mem>> -> memref<1x!tpu.dma_semaphore, #tpu.memory_space<semaphore_mem>>
    %36 = tpu.memref_squeeze %35 : memref<1x!tpu.dma_semaphore, #tpu.memory_space<semaphore_mem>> -> memref<!tpu.dma_semaphore, #tpu.memory_space<semaphore_mem>>
    tpu.enqueue_dma source(%32 : memref<1x128xf32, #tpu.memory_space<vmem>>) target(%34 : memref<1x128xf32, #tpu.memory_space<vmem>>) target_semaphore(%36 : memref<!tpu.dma_semaphore, #tpu.memory_space<semaphore_mem>>)
    %c4_i32 = arith.constant 4 : i32
    %37 = arith.addi %0, %c4_i32 : i32
    %38 = arith.index_cast %37 : i32 to index
    %39 = memref.load %arg1[%38] : memref<14xi32, #tpu.memory_space<smem>>
    %c0_i32_16 = arith.constant 0 : i32
    %c0_i32_17 = arith.constant 0 : i32
    %c0_i32_18 = arith.constant 0 : i32
    %40 = tpu.memref_slice %arg2[%c0_i32_16, %39, %c0_i32_18] : memref<1x9x128xf32, #tpu.memory_space<vmem>> -> memref<1x1x128xf32, #tpu.memory_space<vmem>>
    %41 = tpu.memref_squeeze %40 : memref<1x1x128xf32, #tpu.memory_space<vmem>> -> memref<1x128xf32, #tpu.memory_space<vmem>>
    %c0_i32_19 = arith.constant 0 : i32
    %42 = tpu.memref_slice %arg3[%c0_i32_17, %c4_i32, %c0_i32_19] : memref<1x7x128xf32, #tpu.memory_space<vmem>> -> memref<1x1x128xf32, #tpu.memory_space<vmem>>
    %43 = tpu.memref_squeeze %42 : memref<1x1x128xf32, #tpu.memory_space<vmem>> -> memref<1x128xf32, #tpu.memory_space<vmem>>
    %44 = tpu.memref_slice %arg4[%c4_i32] : memref<7x!tpu.dma_semaphore, #tpu.memory_space<semaphore_mem>> -> memref<1x!tpu.dma_semaphore, #tpu.memory_space<semaphore_mem>>
    %45 = tpu.memref_squeeze %44 : memref<1x!tpu.dma_semaphore, #tpu.memory_space<semaphore_mem>> -> memref<!tpu.dma_semaphore, #tpu.memory_space<semaphore_mem>>
    tpu.enqueue_dma source(%41 : memref<1x128xf32, #tpu.memory_space<vmem>>) target(%43 : memref<1x128xf32, #tpu.memory_space<vmem>>) target_semaphore(%45 : memref<!tpu.dma_semaphore, #tpu.memory_space<semaphore_mem>>)
    %c5_i32 = arith.constant 5 : i32
    %46 = arith.addi %0, %c5_i32 : i32
    %47 = arith.index_cast %46 : i32 to index
    %48 = memref.load %arg1[%47] : memref<14xi32, #tpu.memory_space<smem>>
    %c0_i32_20 = arith.constant 0 : i32
    %c0_i32_21 = arith.constant 0 : i32
    %c0_i32_22 = arith.constant 0 : i32
    %49 = tpu.memref_slice %arg2[%c0_i32_20, %48, %c0_i32_22] : memref<1x9x128xf32, #tpu.memory_space<vmem>> -> memref<1x1x128xf32, #tpu.memory_space<vmem>>
    %50 = tpu.memref_squeeze %49 : memref<1x1x128xf32, #tpu.memory_space<vmem>> -> memref<1x128xf32, #tpu.memory_space<vmem>>
    %c0_i32_23 = arith.constant 0 : i32
    %51 = tpu.memref_slice %arg3[%c0_i32_21, %c5_i32, %c0_i32_23] : memref<1x7x128xf32, #tpu.memory_space<vmem>> -> memref<1x1x128xf32, #tpu.memory_space<vmem>>
    %52 = tpu.memref_squeeze %51 : memref<1x1x128xf32, #tpu.memory_space<vmem>> -> memref<1x128xf32, #tpu.memory_space<vmem>>
    %53 = tpu.memref_slice %arg4[%c5_i32] : memref<7x!tpu.dma_semaphore, #tpu.memory_space<semaphore_mem>> -> memref<1x!tpu.dma_semaphore, #tpu.memory_space<semaphore_mem>>
    %54 = tpu.memref_squeeze %53 : memref<1x!tpu.dma_semaphore, #tpu.memory_space<semaphore_mem>> -> memref<!tpu.dma_semaphore, #tpu.memory_space<semaphore_mem>>
    tpu.enqueue_dma source(%50 : memref<1x128xf32, #tpu.memory_space<vmem>>) target(%52 : memref<1x128xf32, #tpu.memory_space<vmem>>) target_semaphore(%54 : memref<!tpu.dma_semaphore, #tpu.memory_space<semaphore_mem>>)
    %c6_i32 = arith.constant 6 : i32
    %55 = arith.addi %0, %c6_i32 : i32
    %56 = arith.index_cast %55 : i32 to index
    %57 = memref.load %arg1[%56] : memref<14xi32, #tpu.memory_space<smem>>
    %c0_i32_24 = arith.constant 0 : i32
    %c0_i32_25 = arith.constant 0 : i32
    %c0_i32_26 = arith.constant 0 : i32
    %58 = tpu.memref_slice %arg2[%c0_i32_24, %57, %c0_i32_26] : memref<1x9x128xf32, #tpu.memory_space<vmem>> -> memref<1x1x128xf32, #tpu.memory_space<vmem>>
    %59 = tpu.memref_squeeze %58 : memref<1x1x128xf32, #tpu.memory_space<vmem>> -> memref<1x128xf32, #tpu.memory_space<vmem>>
    %c0_i32_27 = arith.constant 0 : i32
    %60 = tpu.memref_slice %arg3[%c0_i32_25, %c6_i32, %c0_i32_27] : memref<1x7x128xf32, #tpu.memory_space<vmem>> -> memref<1x1x128xf32, #tpu.memory_space<vmem>>
    %61 = tpu.memref_squeeze %60 : memref<1x1x128xf32, #tpu.memory_space<vmem>> -> memref<1x128xf32, #tpu.memory_space<vmem>>
    %62 = tpu.memref_slice %arg4[%c6_i32] : memref<7x!tpu.dma_semaphore, #tpu.memory_space<semaphore_mem>> -> memref<1x!tpu.dma_semaphore, #tpu.memory_space<semaphore_mem>>
    %63 = tpu.memref_squeeze %62 : memref<1x!tpu.dma_semaphore, #tpu.memory_space<semaphore_mem>> -> memref<!tpu.dma_semaphore, #tpu.memory_space<semaphore_mem>>
    tpu.enqueue_dma source(%59 : memref<1x128xf32, #tpu.memory_space<vmem>>) target(%61 : memref<1x128xf32, #tpu.memory_space<vmem>>) target_semaphore(%63 : memref<!tpu.dma_semaphore, #tpu.memory_space<semaphore_mem>>)
    %c7_i32_28 = arith.constant 7 : i32
    %c0_i32_29 = arith.constant 0 : i32
    %c0_i32_30 = arith.constant 0 : i32
    %c0_i32_31 = arith.constant 0 : i32
    %c0_i32_32 = arith.constant 0 : i32
    %c0_i32_33 = arith.constant 0 : i32
    %64 = tpu.memref_slice %arg2[%c0_i32_30, %c0_i32_32, %c0_i32_33] : memref<1x9x128xf32, #tpu.memory_space<vmem>> -> memref<1x1x128xf32, #tpu.memory_space<vmem>>
    %65 = tpu.memref_squeeze %64 : memref<1x1x128xf32, #tpu.memory_space<vmem>> -> memref<1x128xf32, #tpu.memory_space<vmem>>
    %c0_i32_34 = arith.constant 0 : i32
    %c0_i32_35 = arith.constant 0 : i32
    %66 = tpu.memref_slice %arg3[%c0_i32_31, %c0_i32_34, %c0_i32_35] : memref<1x7x128xf32, #tpu.memory_space<vmem>> -> memref<1x1x128xf32, #tpu.memory_space<vmem>>
    %67 = tpu.memref_squeeze %66 : memref<1x1x128xf32, #tpu.memory_space<vmem>> -> memref<1x128xf32, #tpu.memory_space<vmem>>
    %68 = tpu.memref_slice %arg4[%c0_i32_29] : memref<7x!tpu.dma_semaphore, #tpu.memory_space<semaphore_mem>> -> memref<1x!tpu.dma_semaphore, #tpu.memory_space<semaphore_mem>>
    %69 = tpu.memref_squeeze %68 : memref<1x!tpu.dma_semaphore, #tpu.memory_space<semaphore_mem>> -> memref<!tpu.dma_semaphore, #tpu.memory_space<semaphore_mem>>
    tpu.wait_dma2 semaphore(%69 : memref<!tpu.dma_semaphore, #tpu.memory_space<semaphore_mem>>) src(%65 : memref<1x128xf32, #tpu.memory_space<vmem>>) dst(%67 : memref<1x128xf32, #tpu.memory_space<vmem>>)
    %c1_i32_36 = arith.constant 1 : i32
    %c0_i32_37 = arith.constant 0 : i32
    %c0_i32_38 = arith.constant 0 : i32
    %c0_i32_39 = arith.constant 0 : i32
    %c0_i32_40 = arith.constant 0 : i32
    %70 = tpu.memref_slice %arg2[%c0_i32_37, %c0_i32_39, %c0_i32_40] : memref<1x9x128xf32, #tpu.memory_space<vmem>> -> memref<1x1x128xf32, #tpu.memory_space<vmem>>
    %71 = tpu.memref_squeeze %70 : memref<1x1x128xf32, #tpu.memory_space<vmem>> -> memref<1x128xf32, #tpu.memory_space<vmem>>
    %c0_i32_41 = arith.constant 0 : i32
    %c0_i32_42 = arith.constant 0 : i32
    %72 = tpu.memref_slice %arg3[%c0_i32_38, %c0_i32_41, %c0_i32_42] : memref<1x7x128xf32, #tpu.memory_space<vmem>> -> memref<1x1x128xf32, #tpu.memory_space<vmem>>
    %73 = tpu.memref_squeeze %72 : memref<1x1x128xf32, #tpu.memory_space<vmem>> -> memref<1x128xf32, #tpu.memory_space<vmem>>
    %74 = tpu.memref_slice %arg4[%c1_i32_36] : memref<7x!tpu.dma_semaphore, #tpu.memory_space<semaphore_mem>> -> memref<1x!tpu.dma_semaphore, #tpu.memory_space<semaphore_mem>>
    %75 = tpu.memref_squeeze %74 : memref<1x!tpu.dma_semaphore, #tpu.memory_space<semaphore_mem>> -> memref<!tpu.dma_semaphore, #tpu.memory_space<semaphore_mem>>
    tpu.wait_dma2 semaphore(%75 : memref<!tpu.dma_semaphore, #tpu.memory_space<semaphore_mem>>) src(%71 : memref<1x128xf32, #tpu.memory_space<vmem>>) dst(%73 : memref<1x128xf32, #tpu.memory_space<vmem>>)
    %c2_i32_43 = arith.constant 2 : i32
    %c0_i32_44 = arith.constant 0 : i32
    %c0_i32_45 = arith.constant 0 : i32
    %c0_i32_46 = arith.constant 0 : i32
    %c0_i32_47 = arith.constant 0 : i32
    %76 = tpu.memref_slice %arg2[%c0_i32_44, %c0_i32_46, %c0_i32_47] : memref<1x9x128xf32, #tpu.memory_space<vmem>> -> memref<1x1x128xf32, #tpu.memory_space<vmem>>
    %77 = tpu.memref_squeeze %76 : memref<1x1x128xf32, #tpu.memory_space<vmem>> -> memref<1x128xf32, #tpu.memory_space<vmem>>
    %c0_i32_48 = arith.constant 0 : i32
    %c0_i32_49 = arith.constant 0 : i32
    %78 = tpu.memref_slice %arg3[%c0_i32_45, %c0_i32_48, %c0_i32_49] : memref<1x7x128xf32, #tpu.memory_space<vmem>> -> memref<1x1x128xf32, #tpu.memory_space<vmem>>
    %79 = tpu.memref_squeeze %78 : memref<1x1x128xf32, #tpu.memory_space<vmem>> -> memref<1x128xf32, #tpu.memory_space<vmem>>
    %80 = tpu.memref_slice %arg4[%c2_i32_43] : memref<7x!tpu.dma_semaphore, #tpu.memory_space<semaphore_mem>> -> memref<1x!tpu.dma_semaphore, #tpu.memory_space<semaphore_mem>>
    %81 = tpu.memref_squeeze %80 : memref<1x!tpu.dma_semaphore, #tpu.memory_space<semaphore_mem>> -> memref<!tpu.dma_semaphore, #tpu.memory_space<semaphore_mem>>
    tpu.wait_dma2 semaphore(%81 : memref<!tpu.dma_semaphore, #tpu.memory_space<semaphore_mem>>) src(%77 : memref<1x128xf32, #tpu.memory_space<vmem>>) dst(%79 : memref<1x128xf32, #tpu.memory_space<vmem>>)
    %c3_i32_50 = arith.constant 3 : i32
    %c0_i32_51 = arith.constant 0 : i32
    %c0_i32_52 = arith.constant 0 : i32
    %c0_i32_53 = arith.constant 0 : i32
    %c0_i32_54 = arith.constant 0 : i32
    %82 = tpu.memref_slice %arg2[%c0_i32_51, %c0_i32_53, %c0_i32_54] : memref<1x9x128xf32, #tpu.memory_space<vmem>> -> memref<1x1x128xf32, #tpu.memory_space<vmem>>
    %83 = tpu.memref_squeeze %82 : memref<1x1x128xf32, #tpu.memory_space<vmem>> -> memref<1x128xf32, #tpu.memory_space<vmem>>
    %c0_i32_55 = arith.constant 0 : i32
    %c0_i32_56 = arith.constant 0 : i32
    %84 = tpu.memref_slice %arg3[%c0_i32_52, %c0_i32_55, %c0_i32_56] : memref<1x7x128xf32, #tpu.memory_space<vmem>> -> memref<1x1x128xf32, #tpu.memory_space<vmem>>
    %85 = tpu.memref_squeeze %84 : memref<1x1x128xf32, #tpu.memory_space<vmem>> -> memref<1x128xf32, #tpu.memory_space<vmem>>
    %86 = tpu.memref_slice %arg4[%c3_i32_50] : memref<7x!tpu.dma_semaphore, #tpu.memory_space<semaphore_mem>> -> memref<1x!tpu.dma_semaphore, #tpu.memory_space<semaphore_mem>>
    %87 = tpu.memref_squeeze %86 : memref<1x!tpu.dma_semaphore, #tpu.memory_space<semaphore_mem>> -> memref<!tpu.dma_semaphore, #tpu.memory_space<semaphore_mem>>
    tpu.wait_dma2 semaphore(%87 : memref<!tpu.dma_semaphore, #tpu.memory_space<semaphore_mem>>) src(%83 : memref<1x128xf32, #tpu.memory_space<vmem>>) dst(%85 : memref<1x128xf32, #tpu.memory_space<vmem>>)
    %c4_i32_57 = arith.constant 4 : i32
    %c0_i32_58 = arith.constant 0 : i32
    %c0_i32_59 = arith.constant 0 : i32
    %c0_i32_60 = arith.constant 0 : i32
    %c0_i32_61 = arith.constant 0 : i32
    %88 = tpu.memref_slice %arg2[%c0_i32_58, %c0_i32_60, %c0_i32_61] : memref<1x9x128xf32, #tpu.memory_space<vmem>> -> memref<1x1x128xf32, #tpu.memory_space<vmem>>
    %89 = tpu.memref_squeeze %88 : memref<1x1x128xf32, #tpu.memory_space<vmem>> -> memref<1x128xf32, #tpu.memory_space<vmem>>
    %c0_i32_62 = arith.constant 0 : i32
    %c0_i32_63 = arith.constant 0 : i32
    %90 = tpu.memref_slice %arg3[%c0_i32_59, %c0_i32_62, %c0_i32_63] : memref<1x7x128xf32, #tpu.memory_space<vmem>> -> memref<1x1x128xf32, #tpu.memory_space<vmem>>
    %91 = tpu.memref_squeeze %90 : memref<1x1x128xf32, #tpu.memory_space<vmem>> -> memref<1x128xf32, #tpu.memory_space<vmem>>
    %92 = tpu.memref_slice %arg4[%c4_i32_57] : memref<7x!tpu.dma_semaphore, #tpu.memory_space<semaphore_mem>> -> memref<1x!tpu.dma_semaphore, #tpu.memory_space<semaphore_mem>>
    %93 = tpu.memref_squeeze %92 : memref<1x!tpu.dma_semaphore, #tpu.memory_space<semaphore_mem>> -> memref<!tpu.dma_semaphore, #tpu.memory_space<semaphore_mem>>
    tpu.wait_dma2 semaphore(%93 : memref<!tpu.dma_semaphore, #tpu.memory_space<semaphore_mem>>) src(%89 : memref<1x128xf32, #tpu.memory_space<vmem>>) dst(%91 : memref<1x128xf32, #tpu.memory_space<vmem>>)
    %c5_i32_64 = arith.constant 5 : i32
    %c0_i32_65 = arith.constant 0 : i32
    %c0_i32_66 = arith.constant 0 : i32
    %c0_i32_67 = arith.constant 0 : i32
    %c0_i32_68 = arith.constant 0 : i32
    %94 = tpu.memref_slice %arg2[%c0_i32_65, %c0_i32_67, %c0_i32_68] : memref<1x9x128xf32, #tpu.memory_space<vmem>> -> memref<1x1x128xf32, #tpu.memory_space<vmem>>
    %95 = tpu.memref_squeeze %94 : memref<1x1x128xf32, #tpu.memory_space<vmem>> -> memref<1x128xf32, #tpu.memory_space<vmem>>
    %c0_i32_69 = arith.constant 0 : i32
    %c0_i32_70 = arith.constant 0 : i32
    %96 = tpu.memref_slice %arg3[%c0_i32_66, %c0_i32_69, %c0_i32_70] : memref<1x7x128xf32, #tpu.memory_space<vmem>> -> memref<1x1x128xf32, #tpu.memory_space<vmem>>
    %97 = tpu.memref_squeeze %96 : memref<1x1x128xf32, #tpu.memory_space<vmem>> -> memref<1x128xf32, #tpu.memory_space<vmem>>
    %98 = tpu.memref_slice %arg4[%c5_i32_64] : memref<7x!tpu.dma_semaphore, #tpu.memory_space<semaphore_mem>> -> memref<1x!tpu.dma_semaphore, #tpu.memory_space<semaphore_mem>>
    %99 = tpu.memref_squeeze %98 : memref<1x!tpu.dma_semaphore, #tpu.memory_space<semaphore_mem>> -> memref<!tpu.dma_semaphore, #tpu.memory_space<semaphore_mem>>
    tpu.wait_dma2 semaphore(%99 : memref<!tpu.dma_semaphore, #tpu.memory_space<semaphore_mem>>) src(%95 : memref<1x128xf32, #tpu.memory_space<vmem>>) dst(%97 : memref<1x128xf32, #tpu.memory_space<vmem>>)
    %c6_i32_71 = arith.constant 6 : i32
    %c0_i32_72 = arith.constant 0 : i32
    %c0_i32_73 = arith.constant 0 : i32
    %c0_i32_74 = arith.constant 0 : i32
    %c0_i32_75 = arith.constant 0 : i32
    %100 = tpu.memref_slice %arg2[%c0_i32_72, %c0_i32_74, %c0_i32_75] : memref<1x9x128xf32, #tpu.memory_space<vmem>> -> memref<1x1x128xf32, #tpu.memory_space<vmem>>
    %101 = tpu.memref_squeeze %100 : memref<1x1x128xf32, #tpu.memory_space<vmem>> -> memref<1x128xf32, #tpu.memory_space<vmem>>
    %c0_i32_76 = arith.constant 0 : i32
    %c0_i32_77 = arith.constant 0 : i32
    %102 = tpu.memref_slice %arg3[%c0_i32_73, %c0_i32_76, %c0_i32_77] : memref<1x7x128xf32, #tpu.memory_space<vmem>> -> memref<1x1x128xf32, #tpu.memory_space<vmem>>
    %103 = tpu.memref_squeeze %102 : memref<1x1x128xf32, #tpu.memory_space<vmem>> -> memref<1x128xf32, #tpu.memory_space<vmem>>
    %104 = tpu.memref_slice %arg4[%c6_i32_71] : memref<7x!tpu.dma_semaphore, #tpu.memory_space<semaphore_mem>> -> memref<1x!tpu.dma_semaphore, #tpu.memory_space<semaphore_mem>>
    %105 = tpu.memref_squeeze %104 : memref<1x!tpu.dma_semaphore, #tpu.memory_space<semaphore_mem>> -> memref<!tpu.dma_semaphore, #tpu.memory_space<semaphore_mem>>
    tpu.wait_dma2 semaphore(%105 : memref<!tpu.dma_semaphore, #tpu.memory_space<semaphore_mem>>) src(%101 : memref<1x128xf32, #tpu.memory_space<vmem>>) dst(%103 : memref<1x128xf32, #tpu.memory_space<vmem>>)
    %c7_i32_78 = arith.constant 7 : i32
    return
  }
  func.func @transform_0(%arg0: i32, %arg1: memref<14xi32, #tpu.memory_space<smem>>) -> (i32, i32, i32) {
    %c0_i32 = arith.constant 0 : i32
    %c0_i32_0 = arith.constant 0 : i32
    %c0_i32_1 = arith.constant 0 : i32
    return %arg0, %c0_i32, %c0_i32_0 : i32, i32, i32
  }
  func.func @transform_1(%arg0: i32, %arg1: memref<14xi32, #tpu.memory_space<smem>>) -> (i32, i32, i32) {
    %c0_i32 = arith.constant 0 : i32
    %c0_i32_0 = arith.constant 0 : i32
    %c0_i32_1 = arith.constant 0 : i32
    return %arg0, %c0_i32, %c0_i32_0 : i32, i32, i32
  }
}

</mosaic_0001>

<bundles_post_ra>
// kernel: tpu_custom_call.1
= control target key start
LH: loop header
LB: loop body
LE: loop exit
PB: predicated region body
PF: predicated region fallthrough
CT: control target
= control target key end

     0   :  { %s800_s0 = inlined_call_operand.vmem [shape: s32[14], index: 0, kind: input, shape index: {}]   ;;  %s801_s1 = inlined_call_operand.vmem [shape: f32[2,9,128], index: 1, kind: input, shape index: {}]   ;;  %s802_s2 = inlined_call_operand.vmem [shape: f32[2,7,128], index: 2, kind: output, shape index: {}]  }
   0x1   :  { %s7_s11 = sshll.u32 %s800_s0, 4  ;;  %s8_s11 = int_to_ptr.vmem [resolvable:$true] %s7_s11 }
   0x2   :  { %s701_s12 = scalar_lea.vmem %s8_s11, 16  ;;  %p706_p1 = scmp.lt.s32.totalorder %s8_s11, %s8_s11 }
   0x3   :  { %p702_p0 = scmp.ne.s32.totalorder %s8_s11, %s701_s12  ;;  %p707_p2 = scmp.lt.s32.totalorder %s701_s12, %s701_s12 }
   0x5   :  { %p708_p3 = por %p707_p2, %p706_p1 }
   0x7   :  { %p709_p4 = pnand %p708_p3, %p702_p0 }
   0x9   :  { %712 = shalt.err (!%p709_p4)  }
   0xa   :  { %s737_s13 = smov [#allocation4]  }
   0xb   :  { %10 = dma.vmem_to_smem %s8_s11, 16, %s737_s13, [#allocation3] }
   0xc   :  { %717 = dma.done.wait [#allocation3], 16 }
   0xd   :  { %718 = vsyncadd [#allocation3], 4294967280 }
   0xe   :  { %12 = sfence }
   0xf   :  { %s756_s14 = smov 0  }
  0x10 LB: > { %s662_s0 = sadd.s32 4294967295, %s735_s14   ;;  %p666_p5 = scmp.ge.s32.totalorder %s735_s14, 1  ;;  %s735_s14 = sphi %s756_s14, %s18_s14  }
  0x11   : > { %p94_p6 = scmp.lt.s32.totalorder %s735_s14, 3 }
  0x13   : > { %p95_p7 = pnand %p666_p5, %p94_p6 }
  0x14   : > { %p113_p8 = scmp.lt.s32.totalorder (!%p95_p7), %s662_s0, 1  ;;  %s764_s15 = smul.u32 (!%p95_p7), 7, %s662_s0 }
  0x15   : > { %98 = sbr.rel (%p95_p7) target bundleno = 109 (0x6d), region = 24 }
  0x16   : > { %s123_s16 = sld [smem:[#allocation4 + %s764_s15]] (!%p95_p7) }
  0x1c   : > { %s804_s0 = smov (!%p113_p8, %s662_s0), 1 }
  0x1d   : > { %s691_s17 = sshll.u32 %s804_s0, 4  ;;  %s669_s18 = sshll.u32 %s804_s0, 3 }
  0x1e   : > { %s770_s21 = scalar_lea.vmem %s801_s1, %s691_s17  ;;  %s775_s24 = scalar_lea.vmem %s802_s2, %s669_s18 }
  0x1f   : > { %s124_s25 = scalar_lea.vmem %s770_s21, %s123_s16 }
  0x20   : > { %v142_v0 = vld [vmem:[%s124_s25] sm:$0x1] }
  0x21   : > { %143 = vst [vmem:[%s775_s24] sm:$0x1] %v142_v0 }
  0x22   : > { %168 = vsyncadd [#allocation2], 16  ;;  %s169_s26 = sadd.s32 1, %s764_s15 }
  0x23   : > { %s170_s27 = sld [smem:[#allocation4 + %s169_s26]] }
  0x29   : > { %s171_s28 = scalar_lea.vmem %s770_s21, %s170_s27 }
  0x2a   : > { %v191_v1 = vld [vmem:[%s171_s28] sm:$0x1] }
  0x2b   : > { %671 = vst [vmem:[%s775_s24 + $0x1] sm:$0x1] %v191_v1 }
  0x2c   : > { %217 = vsyncadd [#allocation2 + $0x1], 16  ;;  %s218_s29 = sadd.s32 2, %s764_s15 }
  0x2d   : > { %s219_s30 = sld [smem:[#allocation4 + %s218_s29]] }
  0x33   : > { %s220_s3 = scalar_lea.vmem %s770_s21, %s219_s30 }
  0x34   : > { %v240_v2 = vld [vmem:[%s220_s3] sm:$0x1] }
  0x35   : > { %673 = vst [vmem:[%s775_s24 + $0x2] sm:$0x1] %v240_v2 }
  0x36   : > { %266 = vsyncadd [#allocation2 + $0x2], 16  ;;  %s267_s4 = sadd.s32 3, %s764_s15 }
  0x37   : > { %s268_s5 = sld [smem:[#allocation4 + %s267_s4]] }
  0x3d   : > { %s269_s6 = scalar_lea.vmem %s770_s21, %s268_s5 }
  0x3e   : > { %v289_v3 = vld [vmem:[%s269_s6] sm:$0x1] }
  0x3f   : > { %675 = vst [vmem:[%s775_s24 + $0x3] sm:$0x1] %v289_v3 }
  0x40   : > { %315 = vsyncadd [#allocation2 + $0x3], 16  ;;  %s316_s7 = sadd.s32 4, %s764_s15 }
  0x41   : > { %s317_s8 = sld [smem:[#allocation4 + %s316_s7]] }
  0x47   : > { %s318_s9 = scalar_lea.vmem %s770_s21, %s317_s8 }
  0x48   : > { %v338_v4 = vld [vmem:[%s318_s9] sm:$0x1] }
  0x49   : > { %677 = vst [vmem:[%s775_s24 + $0x4] sm:$0x1] %v338_v4 }
  0x4a   : > { %364 = vsyncadd [#allocation2 + $0x4], 16  ;;  %s365_s10 = sadd.s32 5, %s764_s15 }
  0x4b   : > { %s366_s11 = sld [smem:[#allocation4 + %s365_s10]] }
  0x51   : > { %s367_s12 = scalar_lea.vmem %s770_s21, %s366_s11 }
  0x52   : > { %v387_v5 = vld [vmem:[%s367_s12] sm:$0x1] }
  0x53   : > { %679 = vst [vmem:[%s775_s24 + $0x5] sm:$0x1] %v387_v5 }
  0x54   : > { %413 = vsyncadd [#allocation2 + $0x5], 16  ;;  %s414_s13 = sadd.s32 6, %s764_s15 }
  0x55   : > { %s415_s0 = sld [smem:[#allocation4 + %s414_s13]] }
  0x5b   : > { %s416_s16 = scalar_lea.vmem %s770_s21, %s415_s0 }
  0x5c   : > { %v436_v6 = vld [vmem:[%s416_s16] sm:$0x1] }
  0x5d   : > { %681 = vst [vmem:[%s775_s24 + $0x6] sm:$0x1] %v436_v6 }
  0x5e   : > { %462 = vsyncadd [#allocation2 + $0x6], 16 }
  0x5f   : > { %719 = dma.done.wait [#allocation2], 16 }
  0x60   : > { %720 = vsyncadd [#allocation2], 4294967280 }
  0x61   : > { %721 = dma.done.wait [#allocation2 + $0x1], 16 }
  0x62   : > { %722 = vsyncadd [#allocation2 + $0x1], 4294967280 }
  0x63   : > { %723 = dma.done.wait [#allocation2 + $0x2], 16 }
  0x64   : > { %724 = vsyncadd [#allocation2 + $0x2], 4294967280 }
  0x65   : > { %725 = dma.done.wait [#allocation2 + $0x3], 16 }
  0x66   : > { %726 = vsyncadd [#allocation2 + $0x3], 4294967280 }
  0x67   : > { %727 = dma.done.wait [#allocation2 + $0x4], 16 }
  0x68   : > { %728 = vsyncadd [#allocation2 + $0x4], 4294967280 }
  0x69   : > { %729 = dma.done.wait [#allocation2 + $0x5], 16 }
  0x6a   : > { %730 = vsyncadd [#allocation2 + $0x5], 4294967280 }
  0x6b   : > { %731 = dma.done.wait [#allocation2 + $0x6], 16 }
  0x6c   : > { %732 = vsyncadd [#allocation2 + $0x6], 4294967280 }
  0x6d PF: > { %s18_s14 = sadd.s32 1, %s735_s14  }
  0x6e   : > { %p15_p9 = scmp.ge.s32.totalorder %s18_s14, 4  }
  0x70   :  { %17 = sbr.rel (!%p15_p9) target bundleno = 16 (0x10), region = 359 }
  0x77   :  { %497 = vsyncmov [#allocation2] }
  0x7a   :  { %s498_s15 = vpop.sfrf %497 }
  0x7b   :  { %p684_p10 = scmp.ne.s32.totalorder %s498_s15, 0 }
  0x7d   :  { %502 = shalt.err (%p684_p10)  }
  0x7e   :  { %504 = vsyncmov [#allocation2 + $0x1] }
  0x81   :  { %s505_s17 = vpop.sfrf %504 }
  0x82   :  { %p685_p11 = scmp.ne.s32.totalorder %s505_s17, 0 }
  0x84   :  { %509 = shalt.err (%p685_p11)  }
  0x85   :  { %511 = vsyncmov [#allocation2 + $0x2] }
  0x88   :  { %s512_s18 = vpop.sfrf %511 }
  0x89   :  { %p686_p12 = scmp.ne.s32.totalorder %s512_s18, 0 }
  0x8b   :  { %516 = shalt.err (%p686_p12)  }
  0x8c   :  { %518 = vsyncmov [#allocation2 + $0x3] }
  0x8f   :  { %s519_s19 = vpop.sfrf %518 }
  0x90   :  { %p687_p13 = scmp.ne.s32.totalorder %s519_s19, 0 }
  0x92   :  { %523 = shalt.err (%p687_p13)  }
  0x93   :  { %525 = vsyncmov [#allocation2 + $0x4] }
  0x96   :  { %s526_s20 = vpop.sfrf %525 }
  0x97   :  { %p688_p0 = scmp.ne.s32.totalorder %s526_s20, 0 }
  0x99   :  { %530 = shalt.err (%p688_p0)  }
  0x9a   :  { %532 = vsyncmov [#allocation2 + $0x5] }
  0x9d   :  { %s533_s1 = vpop.sfrf %532 }
  0x9e   :  { %p689_p1 = scmp.ne.s32.totalorder %s533_s1, 0 }
  0xa0   :  { %537 = shalt.err (%p689_p1)  }
  0xa1   :  { %539 = vsyncmov [#allocation2 + $0x6] }
  0xa4   :  { %s540_s2 = vpop.sfrf %539 }
  0xa5   :  { %p690_p2 = scmp.ne.s32.totalorder %s540_s2, 0 }
  0xa7   :  { %544 = shalt.err (%p690_p2)  }

</bundles_post_ra>
